<compile_context>
chip_gen: v6e
topology: v6e:2x2x1
jax: 0.10.0
libtpu: 0.0.40
codegen_flags: <defaults>
</compile_context>

<pallas_src>
import functools

import jax
import jax.numpy as jnp
from jax.experimental import pallas as pl
from jax.experimental.pallas import tpu as pltpu


def _matmul_bias_silu_kernel(p_ref, w_ref, b_ref, o_ref, acc_ref):
    """Accumulate (tm x tk)@(tk x tn) over the K grid axis, then bias + SiLU."""
    kk = pl.program_id(2)

    @pl.when(kk == 0)
    def _():
        acc_ref[...] = jnp.zeros_like(acc_ref)

    acc_ref[...] += jnp.dot(p_ref[...], w_ref[...],
                            preferred_element_type=jnp.float32)

    @pl.when(kk == pl.num_programs(2) - 1)
    def _():
        y = acc_ref[...] + b_ref[...]                      # (tm,tn) + (1,tn), f32
        sig = pl.reciprocal(1.0 + jnp.exp(-y), approx=True)  # EUP, not VALU
        o_ref[...] = (y * sig).astype(o_ref.dtype)         # SiLU, bf16 store


def _round_up(x, mult):
    return ((x + mult - 1) // mult) * mult


def _cdiv(a, b):
    return -(-a // b)


def _vmem_capacity_bytes():
    try:
        return int(pltpu.get_tpu_info().vmem_capacity_bytes)
    except Exception:
        return 64 * 1024 * 1024   # conservative (v7x per-TC) fallback


def _vmem_bytes(tm, tn, tk):
    """Rough per-step VMEM footprint (Pallas double-buffers the streamed refs)."""
    patches = 2 * tm * tk * 2      # bf16
    weights = 2 * tk * tn * 2      # bf16
    bias = 2 * tn * 4              # f32
    out = 2 * tm * tn * 2          # bf16
    acc = tm * tn * 4              # f32 scratch (single copy)
    return patches + weights + bias + out + acc


def conv_bn_silu(x_nchw, weight, gamma, beta, running_mean, running_var,
                 *, stride, eps=1e-5, tm_max=1024):
    """Forward of `Conv`: act(bn(conv(x))), inference-mode BN.

    x_nchw : (N, C1, H, W) float32
    weight : (C2, C1, K, K) float32   (PyTorch Conv2d layout, bias=False)
    gamma, beta, running_mean, running_var : (C2,) float32
    """
    n, c1, h, w = x_nchw.shape
    c2, c1w, kh, kw = weight.shape
    assert c1 == c1w and kh == kw
    k, s = kh, stride
    h_out = (h - k) // s + 1
    w_out = (w - k) // s + 1
    m = n * h_out * w_out
    ckk = k * k * c1

    # ---- K (reduction) tiling: tk multiple of 128, pad CKK only up to tk*grid_k
    grid_k = _cdiv(ckk, 2048)
    tk = _round_up(_cdiv(ckk, grid_k), 128)
    ckk_pad = tk * grid_k

    # ---- C2 tiling: lane-dense; tn == c2_pad => weight/bias resident (1 DMA)
    c2_pad = _round_up(c2, 128)
    if c2_pad <= 512:
        tn = c2_pad
    elif c2_pad % 512 == 0:
        tn = 512
    elif c2_pad % 256 == 0:
        tn = 256
    else:
        tn = 128
    grid_n = c2_pad // tn

    # ---- M tiling against a chip-aware VMEM budget ----
    cap = _vmem_capacity_bytes()
    budget = max(24 * 2**20, min(64 * 2**20, cap // 2 - 8 * 2**20))
    tm = tm_max
    while tm > 128 and _vmem_bytes(tm, tn, tk) > budget:
        tm //= 2
    tm = min(tm, max(8, _round_up(m, 8)))      # don't exceed the problem
    grid_m = _cdiv(m, tm)                      # last M block may be partial

    # ---- im2col in bf16, CKK zero-padding fused into the concat (one pass) ----
    x_nhwc = jnp.transpose(x_nchw, (0, 2, 3, 1)).astype(jnp.bfloat16)  # (N,H,W,C1)
    taps = [x_nhwc[:, i:i + s * h_out:s, j:j + s * w_out:s, :]
            for i in range(k) for j in range(k)]
    if ckk_pad > ckk:
        taps.append(jnp.zeros((n, h_out, w_out, ckk_pad - ckk), jnp.bfloat16))
    patches = jnp.concatenate(taps, axis=-1).reshape(m, ckk_pad)       # bf16

    # weight (C2,C1,K,K) -> (K,K,C1,C2) -> (CKK, C2), matching the tap ordering
    w_mat = jnp.transpose(weight, (2, 3, 1, 0)).reshape(ckk, c2).astype(jnp.float32)

    # fold BatchNorm (inference) scale into the weight columns; keep only bias.
    scale = gamma / jnp.sqrt(running_var + eps)                 # (C2,)
    bias = (beta - running_mean * scale).astype(jnp.float32)    # (C2,)
    w_mat = (w_mat * scale[None, :]).astype(jnp.bfloat16)
    w_p = jnp.pad(w_mat, ((0, ckk_pad - ckk), (0, c2_pad - c2)))
    bias_p = jnp.pad(bias, (0, c2_pad - c2)).reshape(1, c2_pad)

    # ---- grid order: re-stream the smaller operand (weights vs patch slab) ----
    m_outer = (grid_n == 1) or (ckk_pad * c2_pad * grid_m <= m * ckk_pad * grid_n)
    if m_outer:
        grid = (grid_m, grid_n, grid_k)
        p_map = lambda i, j, kk: (i, kk)
        w_map = lambda i, j, kk: (kk, j)
        b_map = lambda i, j, kk: (0, j)
        o_map = lambda i, j, kk: (i, j)
    else:
        grid = (grid_n, grid_m, grid_k)
        p_map = lambda j, i, kk: (i, kk)
        w_map = lambda j, i, kk: (kk, j)
        b_map = lambda j, i, kk: (0, j)
        o_map = lambda j, i, kk: (i, j)

    working = _vmem_bytes(tm, tn, tk)
    vmem_limit = int(min(cap * 3 // 4, max(32 * 2**20, working + 16 * 2**20)))
    vmem_limit = int(max(vmem_limit, working + 8 * 2**20))

    out = pl.pallas_call(
        _matmul_bias_silu_kernel,
        out_shape=jax.ShapeDtypeStruct((m, c2_pad), jnp.bfloat16),
        grid_spec=pltpu.PrefetchScalarGridSpec(
            num_scalar_prefetch=0,
            grid=grid,
            in_specs=[
                pl.BlockSpec((tm, tk), p_map),      # patches (bf16)
                pl.BlockSpec((tk, tn), w_map),      # BN-scaled weights (bf16)
                pl.BlockSpec((1, tn), b_map),       # BN bias (f32)
            ],
            out_specs=pl.BlockSpec((tm, tn), o_map),
            scratch_shapes=[pltpu.VMEM((tm, tn), jnp.float32)],
        ),
        compiler_params=pltpu.CompilerParams(
            dimension_semantics=("parallel", "parallel", "arbitrary"),
            vmem_limit_bytes=vmem_limit),
    )(patches, w_p, bias_p)

    # (M, C2p) -> (N, Ho, Wo, C2) -> NCHW, cast back to f32 in the same pass.
    out = out[:, :c2].reshape(n, h_out, w_out, c2)
    return jnp.transpose(out, (0, 3, 1, 2)).astype(jnp.float32)


if __name__ == "__main__":
    # Module hyper-params: Conv(c1=4, c2=8, k=3, s=1)
    N, C1, H, W = 2, 4, 16, 16
    C2, K, S = 8, 3, 1

    key = jax.random.PRNGKey(0)
    kx, kw, kg, kb, km, kv = jax.random.split(key, 6)

    x = jax.random.normal(kx, (N, C1, H, W), jnp.float32)
    weight = jax.random.normal(kw, (C2, C1, K, K), jnp.float32) * 0.1
    gamma = jax.random.normal(kg, (C2,), jnp.float32) * 0.1 + 1.0
    beta = jax.random.normal(kb, (C2,), jnp.float32) * 0.1
    running_mean = jax.random.normal(km, (C2,), jnp.float32) * 0.1
    running_var = jax.random.uniform(kv, (C2,), jnp.float32, 0.5, 1.5)

    fn = jax.jit(functools.partial(conv_bn_silu, stride=S))
    y = fn(x, weight, gamma, beta, running_mean, running_var)
    jax.block_until_ready(y)

    h_out = (H - K) // S + 1
    w_out = (W - K) // S + 1
    assert y.shape == (N, C2, h_out, w_out), y.shape

    # Reference: f32 conv + folded inference BN + SiLU (loose tol: bf16 operands)
    conv_ref = jax.lax.conv_general_dilated(
        x, weight, window_strides=(S, S), padding="VALID",
        dimension_numbers=("NCHW", "OIHW", "NCHW"))
    scale_ref = gamma / jnp.sqrt(running_var + 1e-5)
    bias_ref = beta - running_mean * scale_ref
    y_ref = conv_ref * scale_ref[None, :, None, None] + bias_ref[None, :, None, None]
    y_ref = y_ref * jax.nn.sigmoid(y_ref)
    assert jnp.allclose(y, y_ref, atol=5e-2, rtol=5e-2), float(
        jnp.max(jnp.abs(y - y_ref)))

    print("KERNEL_OK")
</pallas_src>

<mosaic_0001>
module attributes {stable_mosaic.version = 11 : i64} {
  func.func @_matmul_bias_silu_kernel(%arg0: i32, %arg1: i32, %arg2: i32, %arg3: memref<392x128xbf16, #tpu.memory_space<vmem>>, %arg4: memref<128x128xbf16, #tpu.memory_space<vmem>>, %arg5: memref<1x128xf32, #tpu.memory_space<vmem>>, %arg6: memref<392x128xbf16, #tpu.memory_space<vmem>>, %arg7: memref<392x128xf32, #tpu.memory_space<vmem>>) attributes {dimension_semantics = [#tpu.dimension_semantics<parallel>, #tpu.dimension_semantics<parallel>, #tpu.dimension_semantics<arbitrary>], iteration_bounds = array<i64: 1, 1, 1>, scalar_prefetch = 0 : i64, scratch_operands = 1 : i64, tpu.core_type = #tpu.core_type<tc>, window_params = [{transform_indices = @transform_0, window_bounds = array<i64: 392, 128>}, {transform_indices = @transform_1, window_bounds = array<i64: 128, 128>}, {transform_indices = @transform_2, window_bounds = array<i64: 1, 128>}, {transform_indices = @transform_3, window_bounds = array<i64: 392, 128>}]} {
    %c0_i32 = arith.constant 0 : i32
    %0 = arith.cmpi eq, %arg2, %c0_i32 : i32
    %1 = arith.extui %0 : i1 to i32
    %c0_i32_0 = arith.constant 0 : i32
    %2 = arith.cmpi ne, %1, %c0_i32_0 : i32
    scf.if %2 {
      %cst_10 = arith.constant 0.000000e+00 : f32
      %12 = vector.broadcast %cst_10 : f32 to vector<392x128xf32>
      %c0_11 = arith.constant 0 : index
      %c0_12 = arith.constant 0 : index
      %13 = vector.load %arg7[%c0_11, %c0_12] : memref<392x128xf32, #tpu.memory_space<vmem>>, vector<392x128xf32>
      tpu.vector_store %arg7[%c0_11, %c0_12], %12 {strides = array<i32>} : memref<392x128xf32, #tpu.memory_space<vmem>>, vector<392x128xf32>,
    } else {
    }
    %c0 = arith.constant 0 : index
    %c0_1 = arith.constant 0 : index
    %3 = vector.load %arg7[%c0, %c0_1] : memref<392x128xf32, #tpu.memory_space<vmem>>, vector<392x128xf32>
    %c0_2 = arith.constant 0 : index
    %c0_3 = arith.constant 0 : index
    %4 = vector.load %arg3[%c0_2, %c0_3] : memref<392x128xbf16, #tpu.memory_space<vmem>>, vector<392x128xbf16>
    %c0_4 = arith.constant 0 : index
    %c0_5 = arith.constant 0 : index
    %5 = vector.load %arg4[%c0_4, %c0_5] : memref<128x128xbf16, #tpu.memory_space<vmem>>, vector<128x128xbf16>
    %cst = arith.constant dense<0.000000e+00> : vector<392x128xf32>
    %6 = tpu.matmul %4, %5, %cst {dimension_numbers = #tpu.dot_dimension_numbers<[1], [0], [0], [1], [0, 0, 1, 1], [], []>} : vector<392x128xbf16>, vector<128x128xbf16>, vector<392x128xf32> -> vector<392x128xf32>
    %7 = arith.addf %3, %6 : vector<392x128xf32>
    %c0_6 = arith.constant 0 : index
    %c0_7 = arith.constant 0 : index
    %8 = vector.load %arg7[%c0_6, %c0_7] : memref<392x128xf32, #tpu.memory_space<vmem>>, vector<392x128xf32>
    tpu.vector_store %arg7[%c0_6, %c0_7], %7 {strides = array<i32>} : memref<392x128xf32, #tpu.memory_space<vmem>>, vector<392x128xf32>,
    %c0_i32_8 = arith.constant 0 : i32
    %9 = arith.cmpi eq, %arg2, %c0_i32_8 : i32
    %10 = arith.extui %9 : i1 to i32
    %c0_i32_9 = arith.constant 0 : i32
    %11 = arith.cmpi ne, %10, %c0_i32_9 : i32
    scf.if %11 {
      %c0_10 = arith.constant 0 : index
      %c0_11 = arith.constant 0 : index
      %12 = vector.load %arg7[%c0_10, %c0_11] : memref<392x128xf32, #tpu.memory_space<vmem>>, vector<392x128xf32>
      %c0_12 = arith.constant 0 : index
      %c0_13 = arith.constant 0 : index
      %13 = vector.load %arg5[%c0_12, %c0_13] : memref<1x128xf32, #tpu.memory_space<vmem>>, vector<1x128xf32>
      %14 = vector.broadcast %13 : vector<1x128xf32> to vector<392x128xf32>
      %15 = arith.addf %12, %14 : vector<392x128xf32>
      %cst_14 = arith.constant 0.000000e+00 : f32
      %16 = vector.broadcast %cst_14 : f32 to vector<392x128xf32>
      %17 = arith.subf %16, %15 : vector<392x128xf32>
      %18 = math.exp %17 : vector<392x128xf32>
      %cst_15 = arith.constant 1.000000e+00 : f32
      %19 = vector.broadcast %cst_15 : f32 to vector<392x128xf32>
      %20 = arith.addf %19, %18 : vector<392x128xf32>
      %21 = tpu.reciprocal %20 {approx = true} : vector<392x128xf32> -> vector<392x128xf32>
      %22 = arith.mulf %15, %21 : vector<392x128xf32>
      %23 = arith.truncf %22 : vector<392x128xf32> to vector<392x128xbf16>
      %c0_16 = arith.constant 0 : index
      %c0_17 = arith.constant 0 : index
      %24 = vector.load %arg6[%c0_16, %c0_17] : memref<392x128xbf16, #tpu.memory_space<vmem>>, vector<392x128xbf16>
      tpu.vector_store %arg6[%c0_16, %c0_17], %23 {strides = array<i32>} : memref<392x128xbf16, #tpu.memory_space<vmem>>, vector<392x128xbf16>,
    } else {
    }
    return
  }
  func.func @transform_0(%arg0: i32, %arg1: i32, %arg2: i32) -> (i32, i32) {
    %c0_i32 = arith.constant 0 : i32
    return %arg0, %arg2 : i32, i32
  }
  func.func @transform_1(%arg0: i32, %arg1: i32, %arg2: i32) -> (i32, i32) {
    %c0_i32 = arith.constant 0 : i32
    return %arg2, %arg1 : i32, i32
  }
  func.func @transform_2(%arg0: i32, %arg1: i32, %arg2: i32) -> (i32, i32) {
    %c0_i32 = arith.constant 0 : i32
    %c0_i32_0 = arith.constant 0 : i32
    return %c0_i32, %arg1 : i32, i32
  }
  func.func @transform_3(%arg0: i32, %arg1: i32, %arg2: i32) -> (i32, i32) {
    %c0_i32 = arith.constant 0 : i32
    return %arg0, %arg1 : i32, i32
  }
}

</mosaic_0001>

<bundles_post_ra>
// kernel: conv_bn_silu.1
= control target key start
LH: loop header
LB: loop body
LE: loop exit
PB: predicated region body
PF: predicated region fallthrough
CT: control target
= control target key end

     0   :  { %v2031_v0 = vmov 0.0   ;;  %vm2032_vm0 = vmmov 0   ;;  %s2543_s1 = inlined_call_operand.vmem [shape: bf16[128,128], index: 1, kind: input, shape index: {}]   ;;  %s2544_s0 = inlined_call_operand.vmem [shape: bf16[392,128], index: 0, kind: input, shape index: {}]   ;;  %s2545_s2 = inlined_call_operand.vmem [shape: f32[1,128], index: 2, kind: input, shape index: {}]   ;;  %s2546_s3 = inlined_call_operand.vmem [shape: bf16[392,128], index: 3, kind: output, shape index: {}]  }
   0x1   :  { %1668 = vmatprep.subr.bf16.mxu0 %v2031_v0  ;;  %1784 = vmatprep.subr.bf16.mxu1 %v2031_v0  ;;  %v1802_v1 = vld [vmem:[%s2543_s1 + $0x38] sm:$0xff]   ;;  %v1803_v2 = vld [vmem:[%s2543_s1 + $0x30] sm:$0xff]   ;;  %v1804_v3 = vld [vmem:[%s2543_s1 + $0x28] sm:$0xff]  }
   0x2   :  { %1684 = vmatprep.mubr.msk.bf16.mxu0 %vm2032_vm0, %v2031_v0  ;;  %1736 = vmatprep.mubr.msk.bf16.mxu1 %vm2032_vm0, %v2031_v0  ;;  %v1805_v4 = vld [vmem:[%s2543_s1 + $0x20] sm:$0xff]   ;;  %v1806_v5 = vld [vmem:[%s2543_s1 + $0x18] sm:$0xff]   ;;  %v1807_v6 = vld [vmem:[%s2543_s1 + $0x10] sm:$0xff]  }
   0x3   :  { %1669 = vmatpush3.bf16.msra.mxu0 %v1802_v1  ;;  %1792 = vmatpush3.bf16.msra.mxu1 %v1802_v1  ;;  %v1808_v7 = vld [vmem:[%s2543_s1 + $0x8] sm:$0xff]   ;;  %v1809_v8 = vld [vmem:[%s2543_s1] sm:$0xff]   ;;  %v1813_v12 = vld [vmem:[%s2544_s0 + $0x70] sm:$0xff]  }
   0x4   :  { %1670 = vmatprep.subr.bf16.mxu0 %v2031_v0  ;;  %1785 = vmatprep.subr.bf16.mxu1 %v2031_v0  ;;  %v1810_v9 = vld [vmem:[%s2544_s0] sm:$0xff]   ;;  %v1811_v10 = vld [vmem:[%s2544_s0 + $0x68] sm:$0xff]   ;;  %v1814_v13 = vld [vmem:[%s2544_s0 + $0x10] sm:$0xff]  }
   0x5   :  { %v1812_v11 = vld [vmem:[%s2544_s0 + $0x8] sm:$0xff]   ;;  %v1815_v14 = vld [vmem:[%s2544_s0 + $0x78] sm:$0xff]   ;;  %v1817_v16 = vld [vmem:[%s2544_s0 + $0x80] sm:$0xff]  }
   0x6   :  { %v1816_v15 = vld [vmem:[%s2544_s0 + $0x18] sm:$0xff]   ;;  %v1818_v17 = vld [vmem:[%s2544_s0 + $0x20] sm:$0xff]   ;;  %v1819_v18 = vld [vmem:[%s2544_s0 + $0x88] sm:$0xff]  }
   0x7   :  { %1671 = vmatpush3.bf16.msra.mxu0 %v1803_v2  ;;  %1793 = vmatpush3.bf16.msra.mxu1 %v1803_v2  ;;  %v1820_v19 = vld [vmem:[%s2544_s0 + $0x28] sm:$0xff]   ;;  %v1821_v20 = vld [vmem:[%s2544_s0 + $0x90] sm:$0xff]   ;;  %v1823_v22 = vld [vmem:[%s2544_s0 + $0x98] sm:$0xff]  }
   0x8   :  { %1672 = vmatprep.subr.bf16.mxu0 %v2031_v0  ;;  %1786 = vmatprep.subr.bf16.mxu1 %v2031_v0  ;;  %v1822_v21 = vld [vmem:[%s2544_s0 + $0x30] sm:$0xff]   ;;  %v1824_v23 = vld [vmem:[%s2544_s0 + $0x38] sm:$0xff]   ;;  %v1825_v24 = vld [vmem:[%s2544_s0 + $0xa0] sm:$0xff]  }
   0x9   :  { %v1826_v25 = vld [vmem:[%s2544_s0 + $0x40] sm:$0xff]   ;;  %v1827_v26 = vld [vmem:[%s2544_s0 + $0xa8] sm:$0xff]   ;;  %v1829_v28 = vld [vmem:[%s2544_s0 + $0xb0] sm:$0xff]  }
   0xa   :  { %v1828_v27 = vld [vmem:[%s2544_s0 + $0x48] sm:$0xff]   ;;  %v1830_v29 = vld [vmem:[%s2544_s0 + $0x50] sm:$0xff]   ;;  %v1831_v30 = vld [vmem:[%s2544_s0 + $0xb8] sm:$0xff]  }
   0xb   :  { %1673 = vmatpush3.bf16.msra.mxu0 %v1804_v3  ;;  %1794 = vmatpush3.bf16.msra.mxu1 %v1804_v3  ;;  %v1832_v31 = vld [vmem:[%s2544_s0 + $0x58] sm:$0xff]   ;;  %v1833_v32 = vld [vmem:[%s2544_s0 + $0xc0] ss:$0 sps:$4 sm:$0xff]  }
   0xc   :  { %1674 = vmatprep.subr.bf16.mxu0 %v2031_v0  ;;  %1787 = vmatprep.subr.bf16.mxu1 %v2031_v0  ;;  %v1834_v33 = vld [vmem:[%s2544_s0 + $0x60] sm:$0xff]  }
   0xd   :  { %v2221_v34 = vld [vmem:[%s2545_s2] ss:$0 sm:$0xff] }
   0xf   :  { %1675 = vmatpush3.bf16.msra.mxu0 %v1805_v4  ;;  %1795 = vmatpush3.bf16.msra.mxu1 %v1805_v4 }
  0x10   :  { %1676 = vmatprep.subr.bf16.mxu0 %v2031_v0  ;;  %1788 = vmatprep.subr.bf16.mxu1 %v2031_v0 }
  0x13   :  { %1677 = vmatpush3.bf16.msra.mxu0 %v1806_v5  ;;  %1796 = vmatpush3.bf16.msra.mxu1 %v1806_v5 }
  0x14   :  { %1678 = vmatprep.subr.bf16.mxu0 %v2031_v0  ;;  %1789 = vmatprep.subr.bf16.mxu1 %v2031_v0 }
  0x17   :  { %1679 = vmatpush3.bf16.msra.mxu0 %v1807_v6  ;;  %1797 = vmatpush3.bf16.msra.mxu1 %v1807_v6 }
  0x18   :  { %1680 = vmatprep.subr.bf16.mxu0 %v2031_v0  ;;  %1790 = vmatprep.subr.bf16.mxu1 %v2031_v0 }
  0x1b   :  { %1681 = vmatpush3.bf16.msra.mxu0 %v1808_v7  ;;  %1798 = vmatpush3.bf16.msra.mxu1 %v1808_v7 }
  0x1c   :  { %1682 = vmatprep.subr.bf16.mxu0 %v2031_v0  ;;  %1791 = vmatprep.subr.bf16.mxu1 %v2031_v0 }
  0x1f   :  { %1683 = vmatpush3.bf16.msra.mxu0 %v1809_v8  ;;  %1799 = vmatpush3.bf16.msra.mxu1 %v1809_v8 }
  0x22   :  { %1685 = vmatmul.mubr.bf16.vlgmr.msra.gmra.mxu0 %v1810_v9  ;;  %1737 = vmatmul.mubr.bf16.vlgmr.msra.gmra.mxu1 %v1811_v10 }
  0x23   :  { %1688 = vmatprep.mubr.msk.bf16.mxu0 %vm2032_vm0, %v2031_v0  ;;  %1740 = vmatprep.mubr.msk.bf16.mxu1 %vm2032_vm0, %v2031_v0 }
  0x2a   :  { %1689 = vmatmul.mubr.bf16.gmra.mxu0 %v1812_v11  ;;  %1741 = vmatmul.mubr.bf16.gmra.mxu1 %v1813_v12 }
  0x2b   :  { %1692 = vmatprep.mubr.msk.bf16.mxu0 %vm2032_vm0, %v2031_v0  ;;  %1744 = vmatprep.mubr.msk.bf16.mxu1 %vm2032_vm0, %v2031_v0 }
  0x32   :  { %1693 = vmatmul.mubr.bf16.gmra.mxu0 %v1814_v13  ;;  %1745 = vmatmul.mubr.bf16.gmra.mxu1 %v1815_v14 }
  0x33   :  { %1696 = vmatprep.mubr.msk.bf16.mxu0 %vm2032_vm0, %v2031_v0  ;;  %1748 = vmatprep.mubr.msk.bf16.mxu1 %vm2032_vm0, %v2031_v0 }
  0x3a   :  { %1697 = vmatmul.mubr.bf16.gmra.mxu0 %v1816_v15  ;;  %1749 = vmatmul.mubr.bf16.gmra.mxu1 %v1817_v16 }
  0x3b   :  { %1700 = vmatprep.mubr.msk.bf16.mxu0 %vm2032_vm0, %v2031_v0  ;;  %1752 = vmatprep.mubr.msk.bf16.mxu1 %vm2032_vm0, %v2031_v0 }
  0x42   :  { %1701 = vmatmul.mubr.bf16.gmra.mxu0 %v1818_v17  ;;  %1753 = vmatmul.mubr.bf16.gmra.mxu1 %v1819_v18 }
  0x43   :  { %1704 = vmatprep.mubr.msk.bf16.mxu0 %vm2032_vm0, %v2031_v0  ;;  %1756 = vmatprep.mubr.msk.bf16.mxu1 %vm2032_vm0, %v2031_v0 }
  0x4a   :  { %1705 = vmatmul.mubr.bf16.gmra.mxu0 %v1820_v19  ;;  %1757 = vmatmul.mubr.bf16.gmra.mxu1 %v1821_v20 }
  0x4b   :  { %1708 = vmatprep.mubr.msk.bf16.mxu0 %vm2032_vm0, %v2031_v0  ;;  %1760 = vmatprep.mubr.msk.bf16.mxu1 %vm2032_vm0, %v2031_v0 }
  0x52   :  { %1709 = vmatmul.mubr.bf16.gmra.mxu0 %v1822_v21  ;;  %1761 = vmatmul.mubr.bf16.gmra.mxu1 %v1823_v22 }
  0x53   :  { %1712 = vmatprep.mubr.msk.bf16.mxu0 %vm2032_vm0, %v2031_v0  ;;  %1764 = vmatprep.mubr.msk.bf16.mxu1 %vm2032_vm0, %v2031_v0 }
  0x5a   :  { %1713 = vmatmul.mubr.bf16.gmra.mxu0 %v1824_v23  ;;  %1765 = vmatmul.mubr.bf16.gmra.mxu1 %v1825_v24 }
  0x5b   :  { %1716 = vmatprep.mubr.msk.bf16.mxu0 %vm2032_vm0, %v2031_v0  ;;  %1768 = vmatprep.mubr.msk.bf16.mxu1 %vm2032_vm0, %v2031_v0 }
  0x62   :  { %1717 = vmatmul.mubr.bf16.gmra.mxu0 %v1826_v25  ;;  %1769 = vmatmul.mubr.bf16.gmra.mxu1 %v1827_v26 }
  0x63   :  { %1720 = vmatprep.mubr.msk.bf16.mxu0 %vm2032_vm0, %v2031_v0  ;;  %1772 = vmatprep.mubr.msk.bf16.mxu1 %vm2032_vm0, %v2031_v0 }
  0x6a   :  { %1721 = vmatmul.mubr.bf16.gmra.mxu0 %v1828_v27  ;;  %1773 = vmatmul.mubr.bf16.gmra.mxu1 %v1829_v28 }
  0x6b   :  { %1724 = vmatprep.mubr.msk.bf16.mxu0 %vm2032_vm0, %v2031_v0  ;;  %1776 = vmatprep.mubr.msk.bf16.mxu1 %vm2032_vm0, %v2031_v0 }
  0x72   :  { %1725 = vmatmul.mubr.bf16.gmra.mxu0 %v1830_v29  ;;  %1777 = vmatmul.mubr.bf16.gmra.mxu1 %v1831_v30 }
  0x73   :  { %1728 = vmatprep.mubr.msk.bf16.mxu0 %vm2032_vm0, %v2031_v0  ;;  %1780 = vmatprep.mubr.msk.bf16.mxu1 %vm2032_vm0, %v2031_v0 }
  0x7a   :  { %1729 = vmatmul.mubr.bf16.gmra.mxu0 %v1832_v31  ;;  %1781 = vmatmul.mubr.bf16.gmra.mxu1 %v1833_v32 }
  0x7b   :  { %1732 = vmatprep.mubr.msk.bf16.mxu0 %vm2032_vm0, %v2031_v0 }
  0x82   :  { %1733 = vmatmul.mubr.bf16.gmra.mxu0 %v1834_v33 }
  0xe2   :  { %v412_v35 = vpop.f32.mrf.mxu0  ;;  %v516_v36 = vpop.f32.mrf.mxu1 }
  0xe3   :  { %v2224_v37 = vadd.f32 %v2221_v34, %v412_v35  ;;  %v2227_v38 = vadd.f32 %v2221_v34, %v516_v36 }
  0xe4   :  { %v1686_v39 = vpop.f32.mrf.mxu0  ;;  %v1738_v40 = vpop.f32.mrf.mxu1 }
  0xe5   :  { %v816_v41 = vsub.f32 0.0, %v2224_v37  ;;  %v842_v42 = vsub.f32 0.0, %v2227_v38 }
  0xe6   :  { %v415_v43 = vpop.f32.mrf.mxu0  ;;  %v519_v44 = vpop.f32.mrf.mxu1 }
  0xe7   :  { %v865_v45 = vmul.f32 1.442695, %v816_v41  ;;  %v917_v46 = vmul.f32 1.442695, %v842_v42  ;;  %v2232_v47 = vadd.f32 %v2221_v34, %v415_v43  ;;  %v2235_v48 = vadd.f32 %v2221_v34, %v519_v44 }
  0xe8   :  { %v1687_v49 = vpop.f32.mrf.mxu0  ;;  %v1739_v50 = vpop.f32.mrf.mxu1 }
  0xe9   :  { %1835 = vpow2.f32 %v865_v45  ;;  %v817_v51 = vsub.f32 0.0, %v2232_v47  ;;  %v843_v52 = vsub.f32 0.0, %v2235_v48 }
  0xea   :  { %1837 = vpow2.f32 %v917_v46  ;;  %v420_v53 = vpop.f32.mrf.mxu0  ;;  %v524_v54 = vpop.f32.mrf.mxu1 }
  0xeb   :  { %v867_v55 = vmul.f32 1.442695, %v817_v51  ;;  %v919_v56 = vmul.f32 1.442695, %v843_v52  ;;  %v2240_v57 = vadd.f32 %v2221_v34, %v420_v53  ;;  %v2243_v58 = vadd.f32 %v2221_v34, %v524_v54 }
  0xec   :  { %v1690_v59 = vpop.f32.mrf.mxu0  ;;  %v1742_v60 = vpop.f32.mrf.mxu1 }
  0xed   :  { %1839 = vpow2.f32 %v867_v55  ;;  %v818_v61 = vsub.f32 0.0, %v2240_v57  ;;  %v844_v62 = vsub.f32 0.0, %v2243_v58 }
  0xee   :  { %1841 = vpow2.f32 %v919_v56  ;;  %v423_v63 = vpop.f32.mrf.mxu0  ;;  %v527_v0 = vpop.f32.mrf.mxu1 }
  0xef   :  { %v869_v1 = vmul.f32 1.442695, %v818_v61  ;;  %v921_v2 = vmul.f32 1.442695, %v844_v62  ;;  %v2248_v3 = vadd.f32 %v2221_v34, %v423_v63  ;;  %v2251_v4 = vadd.f32 %v2221_v34, %v527_v0 }
  0xf0   :  { %v1691_v5 = vpop.f32.mrf.mxu0  ;;  %v1743_v6 = vpop.f32.mrf.mxu1 }
  0xf1   :  { %1843 = vpow2.f32 %v869_v1  ;;  %v819_v7 = vsub.f32 0.0, %v2248_v3  ;;  %v845_v8 = vsub.f32 0.0, %v2251_v4 }
  0xf2   :  { %1845 = vpow2.f32 %v921_v2  ;;  %v428_v9 = vpop.f32.mrf.mxu0  ;;  %v532_v10 = vpop.f32.mrf.mxu1 }
  0xf3   :  { %v871_v11 = vmul.f32 1.442695, %v819_v7  ;;  %v923_v12 = vmul.f32 1.442695, %v845_v8  ;;  %v2256_v13 = vadd.f32 %v2221_v34, %v428_v9  ;;  %v2259_v14 = vadd.f32 %v2221_v34, %v532_v10 }
  0xf4   :  { %v1694_v15 = vpop.f32.mrf.mxu0  ;;  %v1746_v16 = vpop.f32.mrf.mxu1 }
  0xf5   :  { %1847 = vpow2.f32 %v871_v11  ;;  %v820_v17 = vsub.f32 0.0, %v2256_v13  ;;  %v846_v18 = vsub.f32 0.0, %v2259_v14 }
  0xf6   :  { %v1836_v19 = vpop.eup %1835  ;;  %1849 = vpow2.f32 %v923_v12  ;;  %v431_v20 = vpop.f32.mrf.mxu0 }
  0xf7   :  { %v535_v21 = vpop.f32.mrf.mxu1  ;;  %v1838_v22 = vpop.eup %1837  ;;  %v963_v23 = vadd.f32 1.0, %v1836_v19  ;;  %v873_v24 = vmul.f32 1.442695, %v820_v17  ;;  %v2264_v25 = vadd.f32 %v2221_v34, %v431_v20  ;;  %v925_v27 = vmul.f32 1.442695, %v846_v18 }
  0xf8   :  { %v989_v26 = vadd.f32 1.0, %v1838_v22  ;;  %v2267_v28 = vadd.f32 %v2221_v34, %v535_v21  ;;  %v1695_v29 = vpop.f32.mrf.mxu0 }
  0xf9   :  { %v1747_v30 = vpop.f32.mrf.mxu1  ;;  %1851 = vrcp.f32 %v963_v23  ;;  %v821_v31 = vsub.f32 0.0, %v2264_v25 }
  0xfa   :  { %v1840_v32 = vpop.eup %1839  ;;  %1853 = vrcp.f32 %v989_v26  ;;  %v847_v33 = vsub.f32 0.0, %v2267_v28  ;;  %v436_v35 = vpop.f32.mrf.mxu0 }
  0xfb   :  { %v540_v36 = vpop.f32.mrf.mxu1  ;;  %v1842_v39 = vpop.eup %1841  ;;  %v964_v40 = vadd.f32 1.0, %v1840_v32  ;;  %1855 = vpow2.f32 %v873_v24  ;;  %v875_v41 = vmul.f32 1.442695, %v821_v31  ;;  %v2272_v42 = vadd.f32 %v2221_v34, %v436_v35 }
  0xfc   :  { %v990_v43 = vadd.f32 1.0, %v1842_v39  ;;  %1857 = vpow2.f32 %v925_v27  ;;  %v927_v44 = vmul.f32 1.442695, %v847_v33  ;;  %v2275_v45 = vadd.f32 %v2221_v34, %v540_v36  ;;  %v1698_v46 = vpop.f32.mrf.mxu0 }
  0xfd   :  { %v1750_v49 = vpop.f32.mrf.mxu1  ;;  %1859 = vrcp.f32 %v964_v40  ;;  %v822_v50 = vsub.f32 0.0, %v2272_v42 }
  0xfe   :  { %v1844_v51 = vpop.eup %1843  ;;  %1861 = vrcp.f32 %v990_v43  ;;  %v848_v52 = vsub.f32 0.0, %v2275_v45  ;;  %v439_v53 = vpop.f32.mrf.mxu0 }
  0xff   :  { %v543_v54 = vpop.f32.mrf.mxu1  ;;  %v1846_v55 = vpop.eup %1845  ;;  %v965_v56 = vadd.f32 1.0, %v1844_v51  ;;  %1863 = vpow2.f32 %v875_v41  ;;  %v877_v59 = vmul.f32 1.442695, %v822_v50  ;;  %v2280_v60 = vadd.f32 %v2221_v34, %v439_v53 }
 0x100   :  { %v991_v61 = vadd.f32 1.0, %v1846_v55  ;;  %1865 = vpow2.f32 %v927_v44  ;;  %v929_v62 = vmul.f32 1.442695, %v848_v52  ;;  %v2283_v63 = vadd.f32 %v2221_v34, %v543_v54  ;;  %v1699_v0 = vpop.f32.mrf.mxu0 }
 0x101   :  { %v1751_v1 = vpop.f32.mrf.mxu1  ;;  %1867 = vrcp.f32 %v965_v56  ;;  %v823_v2 = vsub.f32 0.0, %v2280_v60 }
 0x102   :  { %v1848_v5 = vpop.eup %1847  ;;  %1869 = vrcp.f32 %v991_v61  ;;  %v849_v6 = vsub.f32 0.0, %v2283_v63  ;;  %v444_v7 = vpop.f32.mrf.mxu0 }
 0x103   :  { %v548_v8 = vpop.f32.mrf.mxu1  ;;  %v1850_v9 = vpop.eup %1849  ;;  %v966_v10 = vadd.f32 1.0, %v1848_v5  ;;  %1871 = vpow2.f32 %v877_v59  ;;  %v879_v11 = vmul.f32 1.442695, %v823_v2  ;;  %v2288_v12 = vadd.f32 %v2221_v34, %v444_v7 }
 0x104   :  { %v992_v15 = vadd.f32 1.0, %v1850_v9  ;;  %1873 = vpow2.f32 %v929_v62  ;;  %v931_v16 = vmul.f32 1.442695, %v849_v6  ;;  %v2291_v17 = vadd.f32 %v2221_v34, %v548_v8  ;;  %v1702_v18 = vpop.f32.mrf.mxu0 }
 0x105   :  { %v1754_v19 = vpop.f32.mrf.mxu1  ;;  %1875 = vrcp.f32 %v966_v10  ;;  %v824_v20 = vsub.f32 0.0, %v2288_v12 }
 0x106   :  { %v1852_v21 = vpop.eup %1851  ;;  %1877 = vrcp.f32 %v992_v15  ;;  %v850_v22 = vsub.f32 0.0, %v2291_v17  ;;  %v447_v23 = vpop.f32.mrf.mxu0 }
 0x107   :  { %v551_v24 = vpop.f32.mrf.mxu1  ;;  %v1854_v26 = vpop.eup %1853  ;;  %1879 = vpow2.f32 %v879_v11  ;;  %v881_v27 = vmul.f32 1.442695, %v824_v20  ;;  %v2296_v29 = vadd.f32 %v2221_v34, %v447_v23  ;;  %v1061_v39 = vmul.f32 %v1852_v21, %v2224_v37 }
 0x108   :  { %v1856_v30 = vpop.eup %1855  ;;  %1881 = vpow2.f32 %v931_v16  ;;  %v933_v31 = vmul.f32 1.442695, %v850_v22  ;;  %v2299_v32 = vadd.f32 %v2221_v34, %v551_v24  ;;  %v1703_v33 = vpop.f32.mrf.mxu0  ;;  %v1087_v44 = vmul.f32 %v1854_v26, %v2227_v38 }
 0x109   :  { %v1755_v35 = vpop.f32.mrf.mxu1  ;;  %v1858_v36 = vpop.eup %1857  ;;  %v967_v40 = vadd.f32 1.0, %v1856_v30  ;;  %1883 = vpow2.f32 %v881_v27  ;;  %v825_v41 = vsub.f32 0.0, %v2296_v29 }
 0x10a   :  { %v1860_v43 = vpop.eup %1859  ;;  %v993_v46 = vadd.f32 1.0, %v1858_v36  ;;  %1885 = vpow2.f32 %v933_v31  ;;  %v851_v49 = vsub.f32 0.0, %v2299_v32  ;;  %v452_v50 = vpop.f32.mrf.mxu0 }
 0x10b   :  { %v556_v51 = vpop.f32.mrf.mxu1  ;;  %v1862_v52 = vpop.eup %1861  ;;  %v1062_v53 = vmul.f32 %v1860_v43, %v2232_v47  ;;  %1887 = vrcp.f32 %v967_v40  ;;  %v883_v54 = vmul.f32 1.442695, %v825_v41  ;;  %v2307_v37 = vadd.f32 %v2221_v34, %v452_v50 }
 0x10c   :  { %v1864_v55 = vpop.eup %1863  ;;  %v1088_v56 = vmul.f32 %v1862_v52, %v2235_v48  ;;  %1889 = vrcp.f32 %v993_v46  ;;  %v935_v59 = vmul.f32 1.442695, %v851_v49  ;;  %v2311_v38 = vadd.f32 %v2221_v34, %v556_v51  ;;  %v1706_v61 = vpop.f32.mrf.mxu0 }
 0x10d   :  { %v1758_v62 = vpop.f32.mrf.mxu1  ;;  %v1866_v0 = vpop.eup %1865  ;;  %v1495_v1 = vpack.c.bf16 %v1062_v53, %v1061_v39  ;;  %v968_v2 = vadd.f32 1.0, %v1864_v55  ;;  %1891 = vpow2.f32 %v883_v54  ;;  %v826_v47 = vsub.f32 0.0, %v2307_v37 }
 0x10e   :  { %v1868_v5 = vpop.eup %1867  ;;  %v1560_v6 = vpack.c.bf16 %v1088_v56, %v1087_v44  ;;  %v994_v7 = vadd.f32 1.0, %v1866_v0  ;;  %1893 = vpow2.f32 %v935_v59  ;;  %v852_v8 = vsub.f32 0.0, %v2311_v38  ;;  %v455_v48 = vpop.f32.mrf.mxu0 }
 0x10f   :  { %v559_v9 = vpop.f32.mrf.mxu1  ;;  %v1870_v10 = vpop.eup %1869  ;;  %1496 = vst [vmem:[%s2546_s3] sm:$0xff] %v1495_v1   ;;  %1895 = vrcp.f32 %v968_v2  ;;  %v885_v11 = vmul.f32 1.442695, %v826_v47  ;;  %v2319_v15 = vadd.f32 %v2221_v34, %v455_v48  ;;  %v1063_v23 = vmul.f32 %v1868_v5, %v2240_v57 }
 0x110   :  { %v1872_v16 = vpop.eup %1871  ;;  %1624 = vst [vmem:[%s2546_s3 + $0x68] sm:$0xff] %v1560_v6   ;;  %1897 = vrcp.f32 %v994_v7  ;;  %v937_v18 = vmul.f32 1.442695, %v852_v8  ;;  %v2325_v19 = vadd.f32 %v2221_v34, %v559_v9  ;;  %v1707_v20 = vpop.f32.mrf.mxu0  ;;  %v1089_v30 = vmul.f32 %v1870_v10, %v2243_v58 }
 0x111   :  { %v1759_v21 = vpop.f32.mrf.mxu1  ;;  %v1874_v22 = vpop.eup %1873  ;;  %v969_v24 = vadd.f32 1.0, %v1872_v16  ;;  %1899 = vpow2.f32 %v885_v11  ;;  %v827_v26 = vsub.f32 0.0, %v2319_v15 }
 0x112   :  { %v1876_v27 = vpop.eup %1875  ;;  %v995_v31 = vadd.f32 1.0, %v1874_v22  ;;  %1901 = vpow2.f32 %v937_v18  ;;  %v853_v33 = vsub.f32 0.0, %v2325_v19  ;;  %v460_v35 = vpop.f32.mrf.mxu0 }
 0x113   :  { %v564_v36 = vpop.f32.mrf.mxu1  ;;  %v1878_v39 = vpop.eup %1877  ;;  %v1064_v40 = vmul.f32 %v1876_v27, %v2248_v3  ;;  %1903 = vrcp.f32 %v969_v24  ;;  %v887_v41 = vmul.f32 1.442695, %v827_v26  ;;  %v2333_v57 = vadd.f32 %v2221_v34, %v460_v35 }
 0x114   :  { %v1880_v43 = vpop.eup %1879  ;;  %v1090_v44 = vmul.f32 %v1878_v39, %v2251_v4  ;;  %1905 = vrcp.f32 %v995_v31  ;;  %v939_v46 = vmul.f32 1.442695, %v853_v33  ;;  %v2337_v58 = vadd.f32 %v2221_v34, %v564_v36  ;;  %v1710_v49 = vpop.f32.mrf.mxu0 }
 0x115   :  { %v1762_v50 = vpop.f32.mrf.mxu1  ;;  %v1882_v51 = vpop.eup %1881  ;;  %v1500_v52 = vpack.c.bf16 %v1064_v40, %v1063_v23  ;;  %v970_v53 = vadd.f32 1.0, %v1880_v43  ;;  %1907 = vpow2.f32 %v887_v41  ;;  %v828_v3 = vsub.f32 0.0, %v2333_v57 }
 0x116   :  { %v1884_v54 = vpop.eup %1883  ;;  %v1565_v55 = vpack.c.bf16 %v1090_v44, %v1089_v30  ;;  %v996_v56 = vadd.f32 1.0, %v1882_v51  ;;  %1909 = vpow2.f32 %v939_v46  ;;  %v854_v59 = vsub.f32 0.0, %v2337_v58  ;;  %v463_v4 = vpop.f32.mrf.mxu0 }
 0x117   :  { %v567_v61 = vpop.f32.mrf.mxu1  ;;  %v1886_v62 = vpop.eup %1885  ;;  %1612 = vst [vmem:[%s2546_s3 + $0x8] sm:$0xff] %v1500_v52   ;;  %1911 = vrcp.f32 %v970_v53  ;;  %v971_v0 = vadd.f32 1.0, %v1884_v54  ;;  %v889_v1 = vmul.f32 1.442695, %v828_v3  ;;  %v2345_v2 = vadd.f32 %v2221_v34, %v463_v4 }
 0x118   :  { %v1888_v47 = vpop.eup %1887  ;;  %1625 = vst [vmem:[%s2546_s3 + $0x70] sm:$0xff] %v1565_v55   ;;  %1913 = vrcp.f32 %v996_v56  ;;  %v997_v5 = vadd.f32 1.0, %v1886_v62  ;;  %v941_v6 = vmul.f32 1.442695, %v854_v59  ;;  %v2351_v7 = vadd.f32 %v2221_v34, %v567_v61  ;;  %v1711_v8 = vpop.f32.mrf.mxu0 }
 0x119   :  { %v1763_v48 = vpop.f32.mrf.mxu1  ;;  %v1890_v9 = vpop.eup %1889  ;;  %1915 = vrcp.f32 %v971_v0  ;;  %v829_v10 = vsub.f32 0.0, %v2345_v2  ;;  %v1065_v39 = vmul.f32 %v1888_v47, %v2256_v13 }
 0x11a   :  { %v1892_v11 = vpop.eup %1891  ;;  %1917 = vrcp.f32 %v997_v5  ;;  %v855_v16 = vsub.f32 0.0, %v2351_v7  ;;  %v468_v18 = vpop.f32.mrf.mxu0  ;;  %v1091_v44 = vmul.f32 %v1890_v9, %v2259_v14 }
 0x11b   :  { %v572_v20 = vpop.f32.mrf.mxu1  ;;  %v1894_v21 = vpop.eup %1893  ;;  %v972_v22 = vadd.f32 1.0, %v1892_v11  ;;  %1919 = vpow2.f32 %v889_v1  ;;  %v891_v23 = vmul.f32 1.442695, %v829_v10  ;;  %v2356_v24 = vadd.f32 %v2221_v34, %v468_v18 }
 0x11c   :  { %v1896_v26 = vpop.eup %1895  ;;  %v998_v27 = vadd.f32 1.0, %v1894_v21  ;;  %1921 = vpow2.f32 %v941_v6  ;;  %v943_v30 = vmul.f32 1.442695, %v855_v16  ;;  %v2359_v31 = vadd.f32 %v2221_v34, %v572_v20  ;;  %v1714_v33 = vpop.f32.mrf.mxu0 }
 0x11d   :  { %v1766_v35 = vpop.f32.mrf.mxu1  ;;  %v1898_v36 = vpop.eup %1897  ;;  %v1066_v40 = vmul.f32 %v1896_v26, %v2264_v25  ;;  %1923 = vrcp.f32 %v972_v22  ;;  %v830_v41 = vsub.f32 0.0, %v2356_v24 }
 0x11e   :  { %v1900_v43 = vpop.eup %1899  ;;  %v1092_v46 = vmul.f32 %v1898_v36, %v2267_v28  ;;  %1925 = vrcp.f32 %v998_v27  ;;  %v856_v49 = vsub.f32 0.0, %v2359_v31  ;;  %v471_v50 = vpop.f32.mrf.mxu0 }
 0x11f   :  { %v575_v51 = vpop.f32.mrf.mxu1  ;;  %v1902_v52 = vpop.eup %1901  ;;  %v1505_v53 = vpack.c.bf16 %v1066_v40, %v1065_v39  ;;  %v973_v3 = vadd.f32 1.0, %v1900_v43  ;;  %1927 = vpow2.f32 %v891_v23  ;;  %v893_v13 = vmul.f32 1.442695, %v830_v41 }
 0x120   :  { %v1904_v54 = vpop.eup %1903  ;;  %v1570_v25 = vpack.c.bf16 %v1092_v46, %v1091_v44  ;;  %v999_v55 = vadd.f32 1.0, %v1902_v52  ;;  %1929 = vpow2.f32 %v943_v30  ;;  %v945_v56 = vmul.f32 1.442695, %v856_v49  ;;  %v1715_v59 = vpop.f32.mrf.mxu0 }
 0x121   :  { %v1767_v4 = vpop.f32.mrf.mxu1  ;;  %v1906_v14 = vpop.eup %1905  ;;  %1613 = vst [vmem:[%s2546_s3 + $0x10] sm:$0xff] %v1505_v53   ;;  %1931 = vrcp.f32 %v973_v3  ;;  %v2371_v28 = vadd.f32 %v2221_v34, %v471_v50  ;;  %v2374_v61 = vadd.f32 %v2221_v34, %v575_v51  ;;  %v1067_v0 = vmul.f32 %v1904_v54, %v2272_v42 }
 0x122   :  { %v1908_v62 = vpop.eup %1907  ;;  %1626 = vst [vmem:[%s2546_s3 + $0x78] sm:$0xff] %v1570_v25   ;;  %v1093_v1 = vmul.f32 %v1906_v14, %v2275_v45  ;;  %1933 = vrcp.f32 %v999_v55  ;;  %v476_v47 = vpop.f32.mrf.mxu0 }
 0x123   :  { %v580_v5 = vpop.f32.mrf.mxu1  ;;  %v1910_v6 = vpop.eup %1909  ;;  %v974_v8 = vadd.f32 1.0, %v1908_v62  ;;  %1935 = vpow2.f32 %v893_v13  ;;  %v831_v48 = vsub.f32 0.0, %v2371_v28  ;;  %v857_v9 = vsub.f32 0.0, %v2374_v61 }
 0x124   :  { %v1912_v10 = vpop.eup %1911  ;;  %v1000_v11 = vadd.f32 1.0, %v1910_v6  ;;  %1937 = vpow2.f32 %v945_v56  ;;  %v2384_v16 = vadd.f32 %v2221_v34, %v476_v47  ;;  %v2387_v42 = vadd.f32 %v2221_v34, %v580_v5  ;;  %v1718_v45 = vpop.f32.mrf.mxu0 }
 0x125   :  { %v1770_v18 = vpop.f32.mrf.mxu1  ;;  %v1914_v20 = vpop.eup %1913  ;;  %v1068_v21 = vmul.f32 %v1912_v10, %v2280_v60  ;;  %1939 = vrcp.f32 %v974_v8  ;;  %v895_v22 = vmul.f32 1.442695, %v831_v48  ;;  %v947_v23 = vmul.f32 1.442695, %v857_v9 }
 0x126   :  { %v1916_v26 = vpop.eup %1915  ;;  %v1094_v27 = vmul.f32 %v1914_v20, %v2283_v63  ;;  %1941 = vrcp.f32 %v1000_v11  ;;  %v832_v30 = vsub.f32 0.0, %v2384_v16  ;;  %v858_v33 = vsub.f32 0.0, %v2387_v42  ;;  %v479_v35 = vpop.f32.mrf.mxu0 }
 0x127   :  { %v583_v36 = vpop.f32.mrf.mxu1  ;;  %v1918_v39 = vpop.eup %1917  ;;  %v1510_v40 = vpack.c.bf16 %v1068_v21, %v1067_v0  ;;  %1943 = vpow2.f32 %v895_v22  ;;  %v2394_v41 = vadd.f32 %v2221_v34, %v479_v35  ;;  %v1069_v13 = vmul.f32 %v1916_v26, %v2288_v12 }
 0x128   :  { %v1920_v60 = vpop.eup %1919  ;;  %v1575_v43 = vpack.c.bf16 %v1094_v27, %v1093_v1  ;;  %1945 = vpow2.f32 %v947_v23  ;;  %v897_v44 = vmul.f32 1.442695, %v832_v30  ;;  %v1719_v46 = vpop.f32.mrf.mxu0  ;;  %v949_v51 = vmul.f32 1.442695, %v858_v33 }
 0x129   :  { %v1771_v49 = vpop.f32.mrf.mxu1  ;;  %v1922_v63 = vpop.eup %1921  ;;  %1614 = vst [vmem:[%s2546_s3 + $0x18] sm:$0xff] %v1510_v40   ;;  %v975_v50 = vadd.f32 1.0, %v1920_v60  ;;  %v833_v52 = vsub.f32 0.0, %v2394_v41  ;;  %v2401_v53 = vadd.f32 %v2221_v34, %v583_v36  ;;  %v1095_v54 = vmul.f32 %v1918_v39, %v2291_v17 }
 0x12a   :  { %v1924_v3 = vpop.eup %1923  ;;  %1627 = vst [vmem:[%s2546_s3 + $0x80] sm:$0xff] %v1575_v43   ;;  %v1001_v25 = vadd.f32 1.0, %v1922_v63  ;;  %1947 = vpow2.f32 %v897_v44  ;;  %v484_v55 = vpop.f32.mrf.mxu0 }
 0x12b   :  { %v588_v56 = vpop.f32.mrf.mxu1  ;;  %v1926_v59 = vpop.eup %1925  ;;  %v1070_v4 = vmul.f32 %v1924_v3, %v2296_v29  ;;  %1949 = vrcp.f32 %v975_v50  ;;  %v899_v14 = vmul.f32 1.442695, %v833_v52  ;;  %v859_v62 = vsub.f32 0.0, %v2401_v53 }
 0x12c   :  { %v1928_v0 = vpop.eup %1927  ;;  %v1096_v1 = vmul.f32 %v1926_v59, %v2299_v32  ;;  %1951 = vrcp.f32 %v1001_v25  ;;  %v2412_v47 = vadd.f32 %v2221_v34, %v484_v55  ;;  %v2415_v12 = vadd.f32 %v2221_v34, %v588_v56  ;;  %v1722_v17 = vpop.f32.mrf.mxu0 }
 0x12d   :  { %v1774_v5 = vpop.f32.mrf.mxu1  ;;  %v1930_v6 = vpop.eup %1929  ;;  %v1515_v8 = vpack.c.bf16 %v1070_v4, %v1069_v13  ;;  %v976_v48 = vadd.f32 1.0, %v1928_v0  ;;  %1953 = vpow2.f32 %v949_v51  ;;  %v951_v29 = vmul.f32 1.442695, %v859_v62 }
 0x12e   :  { %v1932_v9 = vpop.eup %1931  ;;  %v1580_v10 = vpack.c.bf16 %v1096_v1, %v1095_v54  ;;  %v1002_v11 = vadd.f32 1.0, %v1930_v6  ;;  %1955 = vpow2.f32 %v899_v14  ;;  %v834_v32 = vsub.f32 0.0, %v2412_v47  ;;  %v487_v45 = vpop.f32.mrf.mxu0 }
 0x12f   :  { %v591_v18 = vpop.f32.mrf.mxu1  ;;  %v1934_v20 = vpop.eup %1933  ;;  %1615 = vst [vmem:[%s2546_s3 + $0x20] sm:$0xff] %v1515_v8   ;;  %1957 = vrcp.f32 %v976_v48  ;;  %v860_v21 = vsub.f32 0.0, %v2415_v12  ;;  %v2423_v22 = vadd.f32 %v2221_v34, %v487_v45  ;;  %v1071_v26 = vmul.f32 %v1932_v9, %v2307_v37 }
 0x130   :  { %v1936_v23 = vpop.eup %1935  ;;  %1628 = vst [vmem:[%s2546_s3 + $0x88] sm:$0xff] %v1580_v10   ;;  %1959 = vrcp.f32 %v1002_v11  ;;  %v901_v27 = vmul.f32 1.442695, %v834_v32  ;;  %v2430_v30 = vadd.f32 %v2221_v34, %v591_v18  ;;  %v1723_v33 = vpop.f32.mrf.mxu0  ;;  %v1097_v44 = vmul.f32 %v1934_v20, %v2311_v38 }
 0x131   :  { %v1775_v35 = vpop.f32.mrf.mxu1  ;;  %v1938_v36 = vpop.eup %1937  ;;  %v977_v39 = vadd.f32 1.0, %v1936_v23  ;;  %1961 = vpow2.f32 %v951_v29  ;;  %v953_v40 = vmul.f32 1.442695, %v860_v21  ;;  %v835_v60 = vsub.f32 0.0, %v2423_v22 }
 0x132   :  { %v1940_v43 = vpop.eup %1939  ;;  %v1003_v46 = vadd.f32 1.0, %v1938_v36  ;;  %1963 = vpow2.f32 %v901_v27  ;;  %v861_v37 = vsub.f32 0.0, %v2430_v30  ;;  %v492_v49 = vpop.f32.mrf.mxu0 }
 0x133   :  { %v596_v63 = vpop.f32.mrf.mxu1  ;;  %v1942_v50 = vpop.eup %1941  ;;  %v1072_v51 = vmul.f32 %v1940_v43, %v2319_v15  ;;  %1965 = vrcp.f32 %v977_v39  ;;  %v903_v52 = vmul.f32 1.442695, %v835_v60  ;;  %v2437_v3 = vadd.f32 %v2221_v34, %v492_v49 }
 0x134   :  { %v1944_v13 = vpop.eup %1943  ;;  %v1098_v54 = vmul.f32 %v1942_v50, %v2325_v19  ;;  %1967 = vrcp.f32 %v1003_v46  ;;  %v955_v25 = vmul.f32 1.442695, %v861_v37  ;;  %v2441_v38 = vadd.f32 %v2221_v34, %v596_v63  ;;  %v1726_v55 = vpop.f32.mrf.mxu0 }
 0x135   :  { %v1778_v56 = vpop.f32.mrf.mxu1  ;;  %v1946_v59 = vpop.eup %1945  ;;  %v1520_v4 = vpack.c.bf16 %v1072_v51, %v1071_v26  ;;  %v978_v14 = vadd.f32 1.0, %v1944_v13  ;;  %1969 = vpow2.f32 %v953_v40  ;;  %v836_v15 = vsub.f32 0.0, %v2437_v3 }
 0x136   :  { %v1585_v62 = vpack.c.bf16 %v1098_v54, %v1097_v44  ;;  %v1004_v0 = vadd.f32 1.0, %v1946_v59  ;;  %1971 = vpow2.f32 %v903_v52  ;;  %v862_v1 = vsub.f32 0.0, %v2441_v38  ;;  %v495_v17 = vpop.f32.mrf.mxu0 }
 0x137   :  { %v599_v19 = vpop.f32.mrf.mxu1  ;;  %v1948_v5 = vpop.eup %1947  ;;  %1616 = vst [vmem:[%s2546_s3 + $0x28] sm:$0xff] %v1520_v4   ;;  %1973 = vrcp.f32 %v978_v14  ;;  %v905_v6 = vmul.f32 1.442695, %v836_v15  ;;  %v2449_v8 = vadd.f32 %v2221_v34, %v495_v17 }
 0x138   :  { %v2452_v48 = vadd.f32 %v2221_v34, %v599_v19  ;;  %v1950_v29 = vpop.eup %1949  ;;  %1629 = vst [vmem:[%s2546_s3 + $0x90] sm:$0xff] %v1585_v62   ;;  %1975 = vrcp.f32 %v1004_v0  ;;  %v979_v9 = vadd.f32 1.0, %v1948_v5  ;;  %v957_v10 = vmul.f32 1.442695, %v862_v1  ;;  %v1727_v11 = vpop.f32.mrf.mxu0 }
 0x139   :  { %v1779_v32 = vpop.f32.mrf.mxu1  ;;  %v1952_v45 = vpop.eup %1951  ;;  %1977 = vpow2.f32 %v955_v25  ;;  %v837_v18 = vsub.f32 0.0, %v2449_v8  ;;  %v1073_v49 = vmul.f32 %v1950_v29, %v2333_v57 }
 0x13a   :  { %v863_v20 = vsub.f32 0.0, %v2452_v48  ;;  %v1954_v21 = vpop.eup %1953  ;;  %1979 = vrcp.f32 %v979_v9  ;;  %v500_v23 = vpop.f32.mrf.mxu0  ;;  %v1099_v63 = vmul.f32 %v1952_v45, %v2337_v58 }
 0x13b   :  { %v604_v26 = vpop.f32.mrf.mxu1  ;;  %v1956_v27 = vpop.eup %1955  ;;  %v1005_v33 = vadd.f32 1.0, %v1954_v21  ;;  %1981 = vpow2.f32 %v905_v6  ;;  %v907_v35 = vmul.f32 1.442695, %v837_v18  ;;  %v2460_v60 = vadd.f32 %v2221_v34, %v500_v23 }
 0x13c   :  { %v959_v36 = vmul.f32 1.442695, %v863_v20  ;;  %v1958_v39 = vpop.eup %1957  ;;  %v980_v40 = vadd.f32 1.0, %v1956_v27  ;;  %1983 = vpow2.f32 %v957_v10  ;;  %v2463_v43 = vadd.f32 %v2221_v34, %v604_v26  ;;  %v1730_v44 = vpop.f32.mrf.mxu0 }
 0x13d   :  { %v1782_v46 = vpop.f32.mrf.mxu1  ;;  %v1960_v37 = vpop.eup %1959  ;;  %v1074_v50 = vmul.f32 %v1958_v39, %v2345_v2  ;;  %1985 = vrcp.f32 %v1005_v33  ;;  %v838_v13 = vsub.f32 0.0, %v2460_v60 }
 0x13e   :  { %v1962_v51 = vpop.eup %1961  ;;  %v1100_v52 = vmul.f32 %v1960_v37, %v2351_v7  ;;  %1987 = vrcp.f32 %v980_v40  ;;  %v864_v54 = vsub.f32 0.0, %v2463_v43  ;;  %v503_v25 = vpop.f32.mrf.mxu0 }
 0x13f   :  { %v607_v55 = vpop.f32.mrf.mxu1  ;;  %v1964_v56 = vpop.eup %1963  ;;  %v1525_v59 = vpack.c.bf16 %v1074_v50, %v1073_v49  ;;  %v1006_v4 = vadd.f32 1.0, %v1962_v51  ;;  %1989 = vpow2.f32 %v907_v35  ;;  %v2472_v57 = vadd.f32 %v2221_v34, %v503_v25 }
 0x140   :  { %v1966_v58 = vpop.eup %1965  ;;  %v1590_v2 = vpack.c.bf16 %v1100_v52, %v1099_v63  ;;  %v981_v14 = vadd.f32 1.0, %v1964_v56  ;;  %1991 = vpow2.f32 %v959_v36  ;;  %v909_v15 = vmul.f32 1.442695, %v838_v13  ;;  %v1731_v7 = vpop.f32.mrf.mxu0 }
 0x141   :  { %v1783_v62 = vpop.f32.mrf.mxu1  ;;  %v1968_v0 = vpop.eup %1967  ;;  %1617 = vst [vmem:[%s2546_s3 + $0x30] sm:$0xff] %v1525_v59   ;;  %1993 = vrcp.f32 %v1006_v4  ;;  %v961_v1 = vmul.f32 1.442695, %v864_v54  ;;  %v839_v17 = vsub.f32 0.0, %v2472_v57  ;;  %v1075_v20 = vmul.f32 %v1966_v58, %v2356_v24 }
 0x142   :  { %v1970_v19 = vpop.eup %1969  ;;  %1630 = vst [vmem:[%s2546_s3 + $0x98] sm:$0xff] %v1590_v2   ;;  %1995 = vrcp.f32 %v981_v14  ;;  %v508_v5 = vpop.f32.mrf.mxu0  ;;  %v1101_v27 = vmul.f32 %v1968_v0, %v2359_v31 }
 0x143   :  { %v1972_v6 = vpop.eup %1971  ;;  %v1007_v29 = vadd.f32 1.0, %v1970_v19  ;;  %1997 = vpow2.f32 %v909_v15  ;;  %v911_v9 = vmul.f32 1.442695, %v839_v17  ;;  %v2482_v10 = vadd.f32 %v2221_v34, %v508_v5 }
 0x144   :  { %v1974_v11 = vpop.eup %1973  ;;  %v982_v32 = vadd.f32 1.0, %v1972_v6  ;;  %1999 = vpow2.f32 %v961_v1  ;;  %v1734_v45 = vpop.f32.mrf.mxu0 }
 0x145   :  { %v1976_v18 = vpop.eup %1975  ;;  %v1076_v21 = vmul.f32 %v1974_v11, %v2371_v28  ;;  %2001 = vrcp.f32 %v1007_v29  ;;  %v840_v23 = vsub.f32 0.0, %v2482_v10 }
 0x146   :  { %v1978_v26 = vpop.eup %1977  ;;  %v1102_v33 = vmul.f32 %v1976_v18, %v2374_v61  ;;  %2003 = vrcp.f32 %v982_v32  ;;  %v511_v35 = vpop.f32.mrf.mxu0 }
 0x147   :  { %v1980_v36 = vpop.eup %1979  ;;  %v1530_v39 = vpack.c.bf16 %v1076_v21, %v1075_v20  ;;  %v1008_v40 = vadd.f32 1.0, %v1978_v26  ;;  %2005 = vpow2.f32 %v911_v9  ;;  %v913_v44 = vmul.f32 1.442695, %v840_v23 }
 0x148   :  { %v1982_v46 = vpop.eup %1981  ;;  %v1595_v37 = vpack.c.bf16 %v1102_v33, %v1101_v27  ;;  %v2490_v24 = vadd.f32 %v2221_v34, %v511_v35  ;;  %v1735_v28 = vpop.f32.mrf.mxu0  ;;  %v1077_v52 = vmul.f32 %v1980_v36, %v2384_v16 }
 0x149   :  { %v1984_v49 = vpop.eup %1983  ;;  %1618 = vst [vmem:[%s2546_s3 + $0x38] sm:$0xff] %v1530_v39   ;;  %2007 = vrcp.f32 %v1008_v40  ;;  %v983_v31 = vadd.f32 1.0, %v1982_v46 }
 0x14a   :  { %v1986_v61 = vpop.eup %1985  ;;  %1631 = vst [vmem:[%s2546_s3 + $0xa0] sm:$0xff] %v1595_v37   ;;  %v1009_v63 = vadd.f32 1.0, %v1984_v49  ;;  %2009 = vpow2.f32 %v913_v44  ;;  %v841_v50 = vsub.f32 0.0, %v2490_v24 }
 0x14b   :  { %v1988_v51 = vpop.eup %1987  ;;  %2011 = vrcp.f32 %v983_v31  ;;  %v1103_v2 = vmul.f32 %v1986_v61, %v2387_v42 }
 0x14c   :  { %v1990_v34 = vpop.eup %1989  ;;  %v1078_v13 = vmul.f32 %v1988_v51, %v2394_v41  ;;  %v915_v54 = vmul.f32 1.442695, %v841_v50  ;;  %2013 = vrcp.f32 %v1009_v63 }
 0x14d   :  { %v1992_v25 = vpop.eup %1991  ;;  %v984_v55 = vadd.f32 1.0, %v1990_v34 }
 0x14e   :  { %v1994_v56 = vpop.eup %1993  ;;  %v1535_v59 = vpack.c.bf16 %v1078_v13, %v1077_v52  ;;  %v1010_v4 = vadd.f32 1.0, %v1992_v25  ;;  %2015 = vpow2.f32 %v915_v54 }
 0x14f   :  { %v1996_v58 = vpop.eup %1995  ;;  %v1104_v14 = vmul.f32 %v1994_v56, %v2401_v53  ;;  %2017 = vrcp.f32 %v984_v55 }
 0x150   :  { %v1998_v15 = vpop.eup %1997  ;;  %1619 = vst [vmem:[%s2546_s3 + $0x40] sm:$0xff] %v1535_v59   ;;  %2019 = vrcp.f32 %v1010_v4  ;;  %v1079_v53 = vmul.f32 %v1996_v58, %v2412_v47 }
 0x151   :  { %v2000_v16 = vpop.eup %1999  ;;  %v1600_v41 = vpack.c.bf16 %v1104_v14, %v1103_v2  ;;  %v985_v7 = vadd.f32 1.0, %v1998_v15 }
 0x152   :  { %v2002_v62 = vpop.eup %2001  ;;  %v1011_v0 = vadd.f32 1.0, %v2000_v16 }
 0x153   :  { %v2004_v1 = vpop.eup %2003  ;;  %1632 = vst [vmem:[%s2546_s3 + $0xa8] sm:$0xff] %v1600_v41   ;;  %v1105_v9 = vmul.f32 %v2002_v62, %v2415_v12 }
 0x154   :  { %v2006_v42 = vpop.eup %2005  ;;  %v1080_v17 = vmul.f32 %v2004_v1, %v2423_v22  ;;  %2021 = vrcp.f32 %v1011_v0 }
 0x155   :  { %2023 = vrcp.f32 %v985_v7  ;;  %v986_v19 = vadd.f32 1.0, %v2006_v42 }
 0x156   :  { %v2008_v5 = vpop.eup %2007  ;;  %v1540_v6 = vpack.c.bf16 %v1080_v17, %v1079_v53 }
 0x157   :  { %v2010_v29 = vpop.eup %2009  ;;  %v1106_v11 = vmul.f32 %v2008_v5, %v2430_v30  ;;  %2025 = vrcp.f32 %v986_v19 }
 0x158   :  { %1620 = vst [vmem:[%s2546_s3 + $0x48] sm:$0xff] %v1540_v6   ;;  %v987_v32 = vadd.f32 1.0, %v2010_v29  ;;  %v2012_v45 = vpop.eup %2011 }
 0x159   :  { %v1605_v47 = vpack.c.bf16 %v1106_v11, %v1105_v9  ;;  %v2014_v18 = vpop.eup %2013  ;;  %v1081_v30 = vmul.f32 %v2012_v45, %v2437_v3 }
 0x15a   :  { %2027 = vrcp.f32 %v987_v32  ;;  %v1107_v26 = vmul.f32 %v2014_v18, %v2441_v38 }
 0x15b   :  { %v2016_v22 = vpop.eup %2015  ;;  %1633 = vst [vmem:[%s2546_s3 + $0xb0] sm:$0xff] %v1605_v47  }
 0x15c   :  { %v2018_v20 = vpop.eup %2017  ;;  %v988_v21 = vadd.f32 1.0, %v2016_v22 }
 0x15d   :  { %v2020_v12 = vpop.eup %2019  ;;  %v1082_v23 = vmul.f32 %v2018_v20, %v2449_v8 }
 0x15e   :  { %v1108_v27 = vmul.f32 %v2020_v12, %v2452_v48  ;;  %2029 = vrcp.f32 %v988_v21 }
 0x15f   :  { %v1545_v33 = vpack.c.bf16 %v1082_v23, %v1081_v30 }
 0x160   :  { %v1610_v35 = vpack.c.bf16 %v1108_v27, %v1107_v26 }
 0x161   :  { %v2022_v36 = vpop.eup %2021  ;;  %1621 = vst [vmem:[%s2546_s3 + $0x50] sm:$0xff] %v1545_v33  }
 0x162   :  { %v2024_v39 = vpop.eup %2023  ;;  %1634 = vst [vmem:[%s2546_s3 + $0xb8] sm:$0xff] %v1610_v35   ;;  %v1109_v3 = vmul.f32 %v2022_v36, %v2463_v43 }
 0x163   :  { %v1083_v38 = vmul.f32 %v2024_v39, %v2460_v60 }
 0x164   :  { %v2026_v8 = vpop.eup %2025  ;;  %v1491_v40 = vpack.c.bf16 %v1109_v3, %v1109_v3 }
 0x165   :  { %v1084_v48 = vmul.f32 %v2026_v8, %v2472_v57 }
 0x166   :  { %1355 = vst [vmem:[%s2546_s3 + $0xc0] sm:$0xf] %v1491_v40 }
 0x167   :  { %v1550_v44 = vpack.c.bf16 %v1084_v48, %v1083_v38  ;;  %v2028_v46 = vpop.eup %2027 }
 0x168   :  { %v1085_v28 = vmul.f32 %v2028_v46, %v2482_v10 }
 0x169   :  { %1622 = vst [vmem:[%s2546_s3 + $0x58] sm:$0xff] %v1550_v44  }
 0x16b   :  { %v2030_v37 = vpop.eup %2029 }
 0x16c   :  { %v1086_v43 = vmul.f32 %v2030_v37, %v2490_v24 }
 0x16e   :  { %v1555_v49 = vpack.c.bf16 %v1086_v43, %v1085_v28 }
 0x170   :  { %1623 = vst [vmem:[%s2546_s3 + $0x60] sm:$0xff] %v1555_v49  }

</bundles_post_ra>
